<compile_context>
chip_gen: v5e
topology: v5e:2x2
jax: 0.10.0
libtpu: 0.0.40
codegen_flags: <defaults>
</compile_context>

<pallas_src>
import functools
import math

import numpy as np
import jax
import jax.numpy as jnp
from jax import lax
from jax.experimental import pallas as pl
from jax.experimental.pallas import tpu as pltpu


def _round_up(v, m):
    return -(-v // m) * m


def _epoched_ff_kernel(xc_ref, xh_ref, fa_ref, fs_ref, o_ref, *, L, K, t_tile, halo_pad):
    """One (b_tile, t_tile) output tile of the epoched causal convolution.

    xc_ref: (b_tile, t_tile)    current time-tile of x
    xh_ref: (b_tile, halo_pad)  lane-aligned halo = x elements just before the tile
                                (block 0 is loaded for the first tile and zeroed in-kernel)
    fa_ref: (b_tile, L)         `filter` argument of forward()  (in-epoch part)
    fs_ref: (b_tile, L)         self.filter                     (future_fill-cache part)
    o_ref : (b_tile, t_tile)
    """
    ti = pl.program_id(1)
    b_tile = o_ref.shape[0]

    x_cur = xc_ref[...]
    if L > 1:
        # Zero the halo for the first time tile: x[t - j] = 0 whenever t < j.
        not_first = (ti > 0).astype(x_cur.dtype)
        halo = xh_ref[...] * not_first
        xw = jnp.concatenate([halo, x_cur], axis=1)   # (b_tile, halo_pad + t_tile), lane-aligned
        off = halo_pad
    else:
        xw = x_cur
        off = 0

    fa = fa_ref[...]
    fs = fs_ref[...]

    # Epoch phase r = (global t) % K for every output lane, computed once per tile.
    t0 = ti * t_tile
    r = (t0 + lax.broadcasted_iota(jnp.int32, (b_tile, t_tile), 1)) % K

    ks = min(K, L)
    # Lag 0 is always inside the current epoch (0 <= r): pure mul, no select.
    acc = xw[:, off: off + t_tile] * fa[:, 0:1]
    # Lags 1 .. K-1: epoch-dependent blend of the two filters (cmp + select on the VPU).
    for j in range(1, ks):
        xs = xw[:, off - j: off - j + t_tile]
        wj = jnp.where(j <= r, fa[:, j:j + 1], fs[:, j:j + 1])
        acc = acc + xs * wj
    # Lags K .. L-1: j > r statically guaranteed -> plain mul-add with self.filter.
    for j in range(ks, L):
        xs = xw[:, off - j: off - j + t_tile]
        acc = acc + xs * fs[:, j:j + 1]

    o_ref[...] = acc


def epoched_future_fill(x, filter_arg, self_filter, K, *, t_tile=None, interpret=False):
    """JAX wrapper: tiling choices + one pipelined Pallas call doing all the compute."""
    x = jnp.asarray(x, jnp.float32)
    fa = jnp.asarray(filter_arg, jnp.float32)
    fs = jnp.asarray(self_filter, jnp.float32)
    B, T = x.shape
    L = fs.shape[-1]
    assert fa.shape == (B, L) and fs.shape == (B, L), "filters must be (B, L)"
    assert 1 <= K <= max(L - 1, 1), "module requires 1 <= epoch length K <= L-1"

    # Lane-aligned halo window covering the L-1 causal lags.
    halo_pad = _round_up(max(L - 1, 1), 128)
    unit = halo_pad                      # t_tile must be a multiple of the halo block size

    if t_tile is None:
        target = 1024                    # ~>=85% of HBM roofline for mem-bound f32 tiles
        if _round_up(T, unit) <= max(target, unit):
            t_tile = _round_up(T, unit)  # single time tile
        else:
            n_t_goal = -(-T // target)
            t_tile = _round_up(-(-T // n_t_goal), unit)
    else:
        t_tile = _round_up(t_tile, unit)
    assert t_tile % halo_pad == 0 and t_tile >= max(L - 1, 1)

    # Fill all 8 sublanes when possible; otherwise keep the whole batch in one block.
    b_tile = 8 if (B % 8 == 0) else B
    n_b = B // b_tile
    n_t = -(-T // t_tile)
    t_pad = n_t * t_tile
    if t_pad != T:
        x = jnp.pad(x, ((0, 0), (0, t_pad - T)))

    halo_ratio = t_tile // halo_pad      # x block-index conversion for the halo spec

    kernel = functools.partial(_epoched_ff_kernel, L=L, K=K, t_tile=t_tile, halo_pad=halo_pad)
    out = pl.pallas_call(
        kernel,
        out_shape=jax.ShapeDtypeStruct((B, t_pad), jnp.float32),
        grid=(n_b, n_t),
        in_specs=[
            # Current time tile of x.
            pl.BlockSpec((b_tile, t_tile), lambda bi, ti: (bi, ti)),
            # Halo: the halo_pad elements immediately before the tile (clamped to block 0 for
            # the first tile; zeroed inside the kernel).
            pl.BlockSpec((b_tile, halo_pad),
                         lambda bi, ti: (bi, jnp.maximum(ti * halo_ratio - 1, 0))),
            # forward() filter and self.filter: VMEM-resident across the time grid.
            pl.BlockSpec((b_tile, L), lambda bi, ti: (bi, 0)),
            pl.BlockSpec((b_tile, L), lambda bi, ti: (bi, 0)),
        ],
        out_specs=pl.BlockSpec((b_tile, t_tile), lambda bi, ti: (bi, ti)),
        compiler_params=pltpu.CompilerParams(
            dimension_semantics=("parallel", "parallel")),
        interpret=interpret,
    )(x, x, fa, fs)
    return out[:, :T] if t_pad != T else out


def _reference_torchlike(x, filter_arg, self_filter, K):
    """Literal numpy re-implementation of EpochedFutureFill.forward (buffer/cache loop)."""
    x = np.asarray(x, np.float64)
    fa = np.asarray(filter_arg, np.float64)
    fs = np.asarray(self_filter, np.float64)
    B, T = x.shape
    cache = np.zeros((B, K))
    buf = np.zeros((B, 0))
    tau = 1
    outs = []
    for t in range(T):
        buf = np.concatenate([buf, x[:, t: t + 1]], axis=1)
        tt = buf.shape[1]
        bslice = buf[:, tt - min(tau, tt): tt][:, ::-1]
        fslice = fa[:, : min(tau, tt)]
        y = (bslice * fslice).sum(axis=1) + cache[:, tau - 1]
        if tau == K:
            # future_fill(buffer, self.filter): linear conv tail, lags tt .. tt+L-2
            full = np.stack([np.convolve(buf[b], fs[b]) for b in range(B)], axis=0)
            cache = full[:, tt: tt + fs.shape[-1] - 1]
            tau = 1
        else:
            tau += 1
        outs.append(y)
    return np.stack(outs, axis=-1)


if __name__ == "__main__":
    # Small deterministic problem: L = 16 -> K = int(sqrt(2*L*log2(L))) = 11 (module default),
    # seq_len = 32 exercises several epoch-boundary cache refreshes.
    bsz, L, seq_len = 2, 16, 32
    K = int(math.sqrt(2 * L * math.log2(L)))

    key = jax.random.PRNGKey(0)
    kx, kf, kg, kh = jax.random.split(key, 4)
    x = jax.random.normal(kx, (bsz, seq_len), dtype=jnp.float32)
    self_filter = jax.random.normal(kf, (bsz, L), dtype=jnp.float32)  # self.filter buffer
    filter_arg = self_filter  # forward(x, filter) is called with the same filter in flash-stu

    out = epoched_future_fill(x, filter_arg, self_filter, K)
    out = jax.block_until_ready(out)
    ref = _reference_torchlike(np.asarray(x), np.asarray(filter_arg),
                               np.asarray(self_filter), K)
    assert out.shape == (bsz, seq_len) and out.dtype == jnp.float32
    np.testing.assert_allclose(np.asarray(out), ref, rtol=1e-4, atol=1e-4)

    # Multi-tile path with explicit small tiles: halo across tiles, tail padding, and a
    # forward() filter distinct from self.filter (exercises the fa/fs epoch blend).
    seq_len2 = 300
    x2 = jax.random.normal(kg, (bsz, seq_len2), dtype=jnp.float32)
    fa2 = jax.random.normal(jax.random.PRNGKey(1), (bsz, L), dtype=jnp.float32)
    out2 = jax.block_until_ready(
        epoched_future_fill(x2, fa2, self_filter, K, t_tile=128))
    ref2 = _reference_torchlike(np.asarray(x2), np.asarray(fa2),
                                np.asarray(self_filter), K)
    np.testing.assert_allclose(np.asarray(out2), ref2, rtol=1e-4, atol=1e-4)

    # Default-tiling path with several ~1024-lane tiles and a non-divisible tail.
    seq_len3 = 1300
    x3 = jax.random.normal(kh, (bsz, seq_len3), dtype=jnp.float32)
    out3 = jax.block_until_ready(
        epoched_future_fill(x3, fa2, self_filter, K))
    ref3 = _reference_torchlike(np.asarray(x3), np.asarray(fa2),
                                np.asarray(self_filter), K)
    np.testing.assert_allclose(np.asarray(out3), ref3, rtol=1e-4, atol=1e-4)

    print("KERNEL_OK")
</pallas_src>

<mosaic_0001>
module attributes {stable_mosaic.version = 11 : i64} {
  func.func @_epoched_ff_kernel(%arg0: i32, %arg1: i32, %arg2: memref<2x128xf32, #tpu.memory_space<vmem>>, %arg3: memref<2x128xf32, #tpu.memory_space<vmem>>, %arg4: memref<2x16xf32, #tpu.memory_space<vmem>>, %arg5: memref<2x16xf32, #tpu.memory_space<vmem>>, %arg6: memref<2x128xf32, #tpu.memory_space<vmem>>) attributes {dimension_semantics = [#tpu.dimension_semantics<parallel>, #tpu.dimension_semantics<parallel>], iteration_bounds = array<i64: 1, 1>, scalar_prefetch = 0 : i64, scratch_operands = 0 : i64, tpu.core_type = #tpu.core_type<tc>, window_params = [{transform_indices = @transform_0, window_bounds = array<i64: 2, 128>}, {transform_indices = @transform_1, window_bounds = array<i64: 2, 128>}, {transform_indices = @transform_2, window_bounds = array<i64: 2, 16>}, {transform_indices = @transform_3, window_bounds = array<i64: 2, 16>}, {transform_indices = @transform_4, window_bounds = array<i64: 2, 128>}]} {
    %c0 = arith.constant 0 : index
    %c0_0 = arith.constant 0 : index
    %0 = vector.load %arg2[%c0, %c0_0] : memref<2x128xf32, #tpu.memory_space<vmem>>, vector<2x128xf32>
    %c0_i32 = arith.constant 0 : i32
    %1 = arith.cmpi sgt, %arg1, %c0_i32 : i32
    %2 = arith.extui %1 : i1 to i32
    %3 = arith.sitofp %2 : i32 to f32
    %c0_1 = arith.constant 0 : index
    %c0_2 = arith.constant 0 : index
    %4 = vector.load %arg3[%c0_1, %c0_2] : memref<2x128xf32, #tpu.memory_space<vmem>>, vector<2x128xf32>
    %5 = vector.broadcast %3 : f32 to vector<2x128xf32>
    %6 = arith.mulf %4, %5 : vector<2x128xf32>
    %7 = tpu.concatenate %6, %0 in 1 : vector<2x128xf32>, vector<2x128xf32> -> vector<2x256xf32>
    %c0_3 = arith.constant 0 : index
    %c0_4 = arith.constant 0 : index
    %8 = vector.load %arg4[%c0_3, %c0_4] : memref<2x16xf32, #tpu.memory_space<vmem>>, vector<2x16xf32>
    %c0_5 = arith.constant 0 : index
    %c0_6 = arith.constant 0 : index
    %9 = vector.load %arg5[%c0_5, %c0_6] : memref<2x16xf32, #tpu.memory_space<vmem>>, vector<2x16xf32>
    %c128_i32 = arith.constant 128 : i32
    %10 = arith.muli %arg1, %c128_i32 : i32
    %11 = tpu.iota {dimensions = array<i32: 1>} : vector<2x128xi32>
    %12 = vector.broadcast %10 : i32 to vector<2x128xi32>
    %13 = arith.addi %12, %11 : vector<2x128xi32>
    %c11_i32 = arith.constant 11 : i32
    %c0_i32_7 = arith.constant 0 : i32
    %14 = arith.cmpi eq, %c11_i32, %c0_i32_7 : i32
    %c1_i32 = arith.constant 1 : i32
    %15 = arith.select %14, %c1_i32, %c11_i32 : i32
    %16 = vector.broadcast %15 : i32 to vector<2x128xi32>
    %17 = arith.remsi %13, %16 : vector<2x128xi32>
    %c0_i32_8 = arith.constant 0 : i32
    %18 = vector.broadcast %c0_i32_8 : i32 to vector<2x128xi32>
    %19 = arith.cmpi ne, %17, %18 : vector<2x128xi32>
    %c0_i32_9 = arith.constant 0 : i32
    %20 = vector.broadcast %c0_i32_9 : i32 to vector<2x128xi32>
    %21 = arith.cmpi slt, %17, %20 : vector<2x128xi32>
    %c0_i32_10 = arith.constant 0 : i32
    %22 = arith.cmpi slt, %15, %c0_i32_10 : i32
    %23 = vector.broadcast %22 : i1 to vector<2x128xi1>
    %24 = vector.broadcast %23 : vector<2x128xi1> to vector<2x128xi1>
    %25 = arith.xori %21, %24 : vector<2x128xi1>
    %26 = arith.andi %25, %19 : vector<2x128xi1>
    %27 = vector.broadcast %15 : i32 to vector<2x128xi32>
    %28 = arith.addi %17, %27 : vector<2x128xi32>
    %29 = arith.select %26, %28, %17 : vector<2x128xi1>, vector<2x128xi32>
    %30 = vector.extract_strided_slice %7 {offsets = [0, 128], sizes = [2, 128], strides = [1, 1]} : vector<2x256xf32> to vector<2x128xf32>
    %31 = vector.extract_strided_slice %8 {offsets = [0, 0], sizes = [2, 1], strides = [1, 1]} : vector<2x16xf32> to vector<2x1xf32>
    %32 = vector.broadcast %31 : vector<2x1xf32> to vector<2x128xf32>
    %33 = arith.mulf %30, %32 : vector<2x128xf32>
    %34 = vector.extract_strided_slice %7 {offsets = [0, 127], sizes = [2, 128], strides = [1, 1]} : vector<2x256xf32> to vector<2x128xf32>
    %c1_i32_11 = arith.constant 1 : i32
    %35 = vector.broadcast %c1_i32_11 : i32 to vector<2x128xi32>
    %36 = arith.cmpi sge, %29, %35 : vector<2x128xi32>
    %37 = vector.extract_strided_slice %8 {offsets = [0, 1], sizes = [2, 1], strides = [1, 1]} : vector<2x16xf32> to vector<2x1xf32>
    %38 = vector.extract_strided_slice %9 {offsets = [0, 1], sizes = [2, 1], strides = [1, 1]} : vector<2x16xf32> to vector<2x1xf32>
    %39 = vector.shape_cast %37 : vector<2x1xf32> to vector<2x1xf32>
    %40 = vector.broadcast %39 : vector<2x1xf32> to vector<2x128xf32>
    %41 = vector.shape_cast %38 : vector<2x1xf32> to vector<2x1xf32>
    %42 = vector.broadcast %41 : vector<2x1xf32> to vector<2x128xf32>
    %43 = arith.select %36, %40, %42 : vector<2x128xi1>, vector<2x128xf32>
    %44 = arith.mulf %34, %43 : vector<2x128xf32>
    %45 = arith.addf %33, %44 : vector<2x128xf32>
    %46 = vector.extract_strided_slice %7 {offsets = [0, 126], sizes = [2, 128], strides = [1, 1]} : vector<2x256xf32> to vector<2x128xf32>
    %c2_i32 = arith.constant 2 : i32
    %47 = vector.broadcast %c2_i32 : i32 to vector<2x128xi32>
    %48 = arith.cmpi sge, %29, %47 : vector<2x128xi32>
    %49 = vector.extract_strided_slice %8 {offsets = [0, 2], sizes = [2, 1], strides = [1, 1]} : vector<2x16xf32> to vector<2x1xf32>
    %50 = vector.extract_strided_slice %9 {offsets = [0, 2], sizes = [2, 1], strides = [1, 1]} : vector<2x16xf32> to vector<2x1xf32>
    %51 = vector.shape_cast %49 : vector<2x1xf32> to vector<2x1xf32>
    %52 = vector.broadcast %51 : vector<2x1xf32> to vector<2x128xf32>
    %53 = vector.shape_cast %50 : vector<2x1xf32> to vector<2x1xf32>
    %54 = vector.broadcast %53 : vector<2x1xf32> to vector<2x128xf32>
    %55 = arith.select %48, %52, %54 : vector<2x128xi1>, vector<2x128xf32>
    %56 = arith.mulf %46, %55 : vector<2x128xf32>
    %57 = arith.addf %45, %56 : vector<2x128xf32>
    %58 = vector.extract_strided_slice %7 {offsets = [0, 125], sizes = [2, 128], strides = [1, 1]} : vector<2x256xf32> to vector<2x128xf32>
    %c3_i32 = arith.constant 3 : i32
    %59 = vector.broadcast %c3_i32 : i32 to vector<2x128xi32>
    %60 = arith.cmpi sge, %29, %59 : vector<2x128xi32>
    %61 = vector.extract_strided_slice %8 {offsets = [0, 3], sizes = [2, 1], strides = [1, 1]} : vector<2x16xf32> to vector<2x1xf32>
    %62 = vector.extract_strided_slice %9 {offsets = [0, 3], sizes = [2, 1], strides = [1, 1]} : vector<2x16xf32> to vector<2x1xf32>
    %63 = vector.shape_cast %61 : vector<2x1xf32> to vector<2x1xf32>
    %64 = vector.broadcast %63 : vector<2x1xf32> to vector<2x128xf32>
    %65 = vector.shape_cast %62 : vector<2x1xf32> to vector<2x1xf32>
    %66 = vector.broadcast %65 : vector<2x1xf32> to vector<2x128xf32>
    %67 = arith.select %60, %64, %66 : vector<2x128xi1>, vector<2x128xf32>
    %68 = arith.mulf %58, %67 : vector<2x128xf32>
    %69 = arith.addf %57, %68 : vector<2x128xf32>
    %70 = vector.extract_strided_slice %7 {offsets = [0, 124], sizes = [2, 128], strides = [1, 1]} : vector<2x256xf32> to vector<2x128xf32>
    %c4_i32 = arith.constant 4 : i32
    %71 = vector.broadcast %c4_i32 : i32 to vector<2x128xi32>
    %72 = arith.cmpi sge, %29, %71 : vector<2x128xi32>
    %73 = vector.extract_strided_slice %8 {offsets = [0, 4], sizes = [2, 1], strides = [1, 1]} : vector<2x16xf32> to vector<2x1xf32>
    %74 = vector.extract_strided_slice %9 {offsets = [0, 4], sizes = [2, 1], strides = [1, 1]} : vector<2x16xf32> to vector<2x1xf32>
    %75 = vector.shape_cast %73 : vector<2x1xf32> to vector<2x1xf32>
    %76 = vector.broadcast %75 : vector<2x1xf32> to vector<2x128xf32>
    %77 = vector.shape_cast %74 : vector<2x1xf32> to vector<2x1xf32>
    %78 = vector.broadcast %77 : vector<2x1xf32> to vector<2x128xf32>
    %79 = arith.select %72, %76, %78 : vector<2x128xi1>, vector<2x128xf32>
    %80 = arith.mulf %70, %79 : vector<2x128xf32>
    %81 = arith.addf %69, %80 : vector<2x128xf32>
    %82 = vector.extract_strided_slice %7 {offsets = [0, 123], sizes = [2, 128], strides = [1, 1]} : vector<2x256xf32> to vector<2x128xf32>
    %c5_i32 = arith.constant 5 : i32
    %83 = vector.broadcast %c5_i32 : i32 to vector<2x128xi32>
    %84 = arith.cmpi sge, %29, %83 : vector<2x128xi32>
    %85 = vector.extract_strided_slice %8 {offsets = [0, 5], sizes = [2, 1], strides = [1, 1]} : vector<2x16xf32> to vector<2x1xf32>
    %86 = vector.extract_strided_slice %9 {offsets = [0, 5], sizes = [2, 1], strides = [1, 1]} : vector<2x16xf32> to vector<2x1xf32>
    %87 = vector.shape_cast %85 : vector<2x1xf32> to vector<2x1xf32>
    %88 = vector.broadcast %87 : vector<2x1xf32> to vector<2x128xf32>
    %89 = vector.shape_cast %86 : vector<2x1xf32> to vector<2x1xf32>
    %90 = vector.broadcast %89 : vector<2x1xf32> to vector<2x128xf32>
    %91 = arith.select %84, %88, %90 : vector<2x128xi1>, vector<2x128xf32>
    %92 = arith.mulf %82, %91 : vector<2x128xf32>
    %93 = arith.addf %81, %92 : vector<2x128xf32>
    %94 = vector.extract_strided_slice %7 {offsets = [0, 122], sizes = [2, 128], strides = [1, 1]} : vector<2x256xf32> to vector<2x128xf32>
    %c6_i32 = arith.constant 6 : i32
    %95 = vector.broadcast %c6_i32 : i32 to vector<2x128xi32>
    %96 = arith.cmpi sge, %29, %95 : vector<2x128xi32>
    %97 = vector.extract_strided_slice %8 {offsets = [0, 6], sizes = [2, 1], strides = [1, 1]} : vector<2x16xf32> to vector<2x1xf32>
    %98 = vector.extract_strided_slice %9 {offsets = [0, 6], sizes = [2, 1], strides = [1, 1]} : vector<2x16xf32> to vector<2x1xf32>
    %99 = vector.shape_cast %97 : vector<2x1xf32> to vector<2x1xf32>
    %100 = vector.broadcast %99 : vector<2x1xf32> to vector<2x128xf32>
    %101 = vector.shape_cast %98 : vector<2x1xf32> to vector<2x1xf32>
    %102 = vector.broadcast %101 : vector<2x1xf32> to vector<2x128xf32>
    %103 = arith.select %96, %100, %102 : vector<2x128xi1>, vector<2x128xf32>
    %104 = arith.mulf %94, %103 : vector<2x128xf32>
    %105 = arith.addf %93, %104 : vector<2x128xf32>
    %106 = vector.extract_strided_slice %7 {offsets = [0, 121], sizes = [2, 128], strides = [1, 1]} : vector<2x256xf32> to vector<2x128xf32>
    %c7_i32 = arith.constant 7 : i32
    %107 = vector.broadcast %c7_i32 : i32 to vector<2x128xi32>
    %108 = arith.cmpi sge, %29, %107 : vector<2x128xi32>
    %109 = vector.extract_strided_slice %8 {offsets = [0, 7], sizes = [2, 1], strides = [1, 1]} : vector<2x16xf32> to vector<2x1xf32>
    %110 = vector.extract_strided_slice %9 {offsets = [0, 7], sizes = [2, 1], strides = [1, 1]} : vector<2x16xf32> to vector<2x1xf32>
    %111 = vector.shape_cast %109 : vector<2x1xf32> to vector<2x1xf32>
    %112 = vector.broadcast %111 : vector<2x1xf32> to vector<2x128xf32>
    %113 = vector.shape_cast %110 : vector<2x1xf32> to vector<2x1xf32>
    %114 = vector.broadcast %113 : vector<2x1xf32> to vector<2x128xf32>
    %115 = arith.select %108, %112, %114 : vector<2x128xi1>, vector<2x128xf32>
    %116 = arith.mulf %106, %115 : vector<2x128xf32>
    %117 = arith.addf %105, %116 : vector<2x128xf32>
    %118 = vector.extract_strided_slice %7 {offsets = [0, 120], sizes = [2, 128], strides = [1, 1]} : vector<2x256xf32> to vector<2x128xf32>
    %c8_i32 = arith.constant 8 : i32
    %119 = vector.broadcast %c8_i32 : i32 to vector<2x128xi32>
    %120 = arith.cmpi sge, %29, %119 : vector<2x128xi32>
    %121 = vector.extract_strided_slice %8 {offsets = [0, 8], sizes = [2, 1], strides = [1, 1]} : vector<2x16xf32> to vector<2x1xf32>
    %122 = vector.extract_strided_slice %9 {offsets = [0, 8], sizes = [2, 1], strides = [1, 1]} : vector<2x16xf32> to vector<2x1xf32>
    %123 = vector.shape_cast %121 : vector<2x1xf32> to vector<2x1xf32>
    %124 = vector.broadcast %123 : vector<2x1xf32> to vector<2x128xf32>
    %125 = vector.shape_cast %122 : vector<2x1xf32> to vector<2x1xf32>
    %126 = vector.broadcast %125 : vector<2x1xf32> to vector<2x128xf32>
    %127 = arith.select %120, %124, %126 : vector<2x128xi1>, vector<2x128xf32>
    %128 = arith.mulf %118, %127 : vector<2x128xf32>
    %129 = arith.addf %117, %128 : vector<2x128xf32>
    %130 = vector.extract_strided_slice %7 {offsets = [0, 119], sizes = [2, 128], strides = [1, 1]} : vector<2x256xf32> to vector<2x128xf32>
    %c9_i32 = arith.constant 9 : i32
    %131 = vector.broadcast %c9_i32 : i32 to vector<2x128xi32>
    %132 = arith.cmpi sge, %29, %131 : vector<2x128xi32>
    %133 = vector.extract_strided_slice %8 {offsets = [0, 9], sizes = [2, 1], strides = [1, 1]} : vector<2x16xf32> to vector<2x1xf32>
    %134 = vector.extract_strided_slice %9 {offsets = [0, 9], sizes = [2, 1], strides = [1, 1]} : vector<2x16xf32> to vector<2x1xf32>
    %135 = vector.shape_cast %133 : vector<2x1xf32> to vector<2x1xf32>
    %136 = vector.broadcast %135 : vector<2x1xf32> to vector<2x128xf32>
    %137 = vector.shape_cast %134 : vector<2x1xf32> to vector<2x1xf32>
    %138 = vector.broadcast %137 : vector<2x1xf32> to vector<2x128xf32>
    %139 = arith.select %132, %136, %138 : vector<2x128xi1>, vector<2x128xf32>
    %140 = arith.mulf %130, %139 : vector<2x128xf32>
    %141 = arith.addf %129, %140 : vector<2x128xf32>
    %142 = vector.extract_strided_slice %7 {offsets = [0, 118], sizes = [2, 128], strides = [1, 1]} : vector<2x256xf32> to vector<2x128xf32>
    %c10_i32 = arith.constant 10 : i32
    %143 = vector.broadcast %c10_i32 : i32 to vector<2x128xi32>
    %144 = arith.cmpi sge, %29, %143 : vector<2x128xi32>
    %145 = vector.extract_strided_slice %8 {offsets = [0, 10], sizes = [2, 1], strides = [1, 1]} : vector<2x16xf32> to vector<2x1xf32>
    %146 = vector.extract_strided_slice %9 {offsets = [0, 10], sizes = [2, 1], strides = [1, 1]} : vector<2x16xf32> to vector<2x1xf32>
    %147 = vector.shape_cast %145 : vector<2x1xf32> to vector<2x1xf32>
    %148 = vector.broadcast %147 : vector<2x1xf32> to vector<2x128xf32>
    %149 = vector.shape_cast %146 : vector<2x1xf32> to vector<2x1xf32>
    %150 = vector.broadcast %149 : vector<2x1xf32> to vector<2x128xf32>
    %151 = arith.select %144, %148, %150 : vector<2x128xi1>, vector<2x128xf32>
    %152 = arith.mulf %142, %151 : vector<2x128xf32>
    %153 = arith.addf %141, %152 : vector<2x128xf32>
    %154 = vector.extract_strided_slice %7 {offsets = [0, 117], sizes = [2, 128], strides = [1, 1]} : vector<2x256xf32> to vector<2x128xf32>
    %155 = vector.extract_strided_slice %9 {offsets = [0, 11], sizes = [2, 1], strides = [1, 1]} : vector<2x16xf32> to vector<2x1xf32>
    %156 = vector.broadcast %155 : vector<2x1xf32> to vector<2x128xf32>
    %157 = arith.mulf %154, %156 : vector<2x128xf32>
    %158 = arith.addf %153, %157 : vector<2x128xf32>
    %159 = vector.extract_strided_slice %7 {offsets = [0, 116], sizes = [2, 128], strides = [1, 1]} : vector<2x256xf32> to vector<2x128xf32>
    %160 = vector.extract_strided_slice %9 {offsets = [0, 12], sizes = [2, 1], strides = [1, 1]} : vector<2x16xf32> to vector<2x1xf32>
    %161 = vector.broadcast %160 : vector<2x1xf32> to vector<2x128xf32>
    %162 = arith.mulf %159, %161 : vector<2x128xf32>
    %163 = arith.addf %158, %162 : vector<2x128xf32>
    %164 = vector.extract_strided_slice %7 {offsets = [0, 115], sizes = [2, 128], strides = [1, 1]} : vector<2x256xf32> to vector<2x128xf32>
    %165 = vector.extract_strided_slice %9 {offsets = [0, 13], sizes = [2, 1], strides = [1, 1]} : vector<2x16xf32> to vector<2x1xf32>
    %166 = vector.broadcast %165 : vector<2x1xf32> to vector<2x128xf32>
    %167 = arith.mulf %164, %166 : vector<2x128xf32>
    %168 = arith.addf %163, %167 : vector<2x128xf32>
    %169 = vector.extract_strided_slice %7 {offsets = [0, 114], sizes = [2, 128], strides = [1, 1]} : vector<2x256xf32> to vector<2x128xf32>
    %170 = vector.extract_strided_slice %9 {offsets = [0, 14], sizes = [2, 1], strides = [1, 1]} : vector<2x16xf32> to vector<2x1xf32>
    %171 = vector.broadcast %170 : vector<2x1xf32> to vector<2x128xf32>
    %172 = arith.mulf %169, %171 : vector<2x128xf32>
    %173 = arith.addf %168, %172 : vector<2x128xf32>
    %174 = vector.extract_strided_slice %7 {offsets = [0, 113], sizes = [2, 128], strides = [1, 1]} : vector<2x256xf32> to vector<2x128xf32>
    %175 = vector.extract_strided_slice %9 {offsets = [0, 15], sizes = [2, 1], strides = [1, 1]} : vector<2x16xf32> to vector<2x1xf32>
    %176 = vector.broadcast %175 : vector<2x1xf32> to vector<2x128xf32>
    %177 = arith.mulf %174, %176 : vector<2x128xf32>
    %178 = arith.addf %173, %177 : vector<2x128xf32>
    %c0_12 = arith.constant 0 : index
    %c0_13 = arith.constant 0 : index
    %179 = vector.load %arg6[%c0_12, %c0_13] : memref<2x128xf32, #tpu.memory_space<vmem>>, vector<2x128xf32>
    tpu.vector_store %arg6[%c0_12, %c0_13], %178 {strides = array<i32>} : memref<2x128xf32, #tpu.memory_space<vmem>>, vector<2x128xf32>,
    return
  }
  func.func @transform_0(%arg0: i32, %arg1: i32) -> (i32, i32) {
    %c0_i32 = arith.constant 0 : i32
    return %arg0, %arg1 : i32, i32
  }
  func.func @transform_1(%arg0: i32, %arg1: i32) -> (i32, i32) {
    %c1_i32 = arith.constant 1 : i32
    %0 = arith.muli %arg1, %c1_i32 : i32
    %c1_i32_0 = arith.constant 1 : i32
    %1 = arith.subi %0, %c1_i32_0 : i32
    %c0_i32 = arith.constant 0 : i32
    %2 = arith.maxsi %1, %c0_i32 : i32
    %c0_i32_1 = arith.constant 0 : i32
    return %arg0, %2 : i32, i32
  }
  func.func @transform_2(%arg0: i32, %arg1: i32) -> (i32, i32) {
    %c0_i32 = arith.constant 0 : i32
    %c0_i32_0 = arith.constant 0 : i32
    return %arg0, %c0_i32 : i32, i32
  }
  func.func @transform_3(%arg0: i32, %arg1: i32) -> (i32, i32) {
    %c0_i32 = arith.constant 0 : i32
    %c0_i32_0 = arith.constant 0 : i32
    return %arg0, %c0_i32 : i32, i32
  }
  func.func @transform_4(%arg0: i32, %arg1: i32) -> (i32, i32) {
    %c0_i32 = arith.constant 0 : i32
    return %arg0, %arg1 : i32, i32
  }
}

</mosaic_0001>

<bundles_post_ra>
// kernel: tpu_custom_call.1
= control target key start
LH: loop header
LB: loop body
LE: loop exit
PB: predicated region body
PF: predicated region fallthrough
CT: control target
= control target key end

     0   :  { %9 = vsyncpa [#allocation3], 0  ;;  %s835_s0 = inlined_call_operand.hbm [shape: f32[2,128], index: 0, kind: input, shape index: {}]   ;;  %s836_s1 = inlined_call_operand.hbm [shape: f32[2,128], index: 1, kind: input, shape index: {}]   ;;  %s837_s2 = inlined_call_operand.hbm [shape: f32[2,16], index: 2, kind: input, shape index: {}]   ;;  %s838_s3 = inlined_call_operand.vmem [shape: f32[2,16], index: 3, kind: input, shape index: {}]   ;;  %s839_s4 = inlined_call_operand.hbm [shape: f32[2,128], index: 4, kind: output, shape index: {}]  }
   0x1   :  { %10 = vsyncpa [#allocation6], 0  ;;  %s33_s17 = sshll.u32 %s836_s1, 4  ;;  %s34_s17 = int_to_ptr.hbm [resolvable:$true] %s33_s17 }
   0x2   :  { %11 = vsyncpa [#allocation4], 0  ;;  %s657_s18 = smov [#allocation5]   ;;  %s17_s22 = sshll.u32 %s835_s0, 4  ;;  %s18_s22 = int_to_ptr.hbm [resolvable:$true] %s17_s22 }
   0x3   :  { %s35_s19 = sshll.u32 %s657_s18, 4  ;;  %s658_s23 = smov [#allocation2]   ;;  %s36_s19 = int_to_ptr.vmem [resolvable:$true] %s35_s19 }
   0x4   :  { %38 = dma.hbm_to_vmem [thread:$0]  %s34_s17, 32, %s36_s19, [#allocation6]  }
   0x5   :  { %s19_s24 = sshll.u32 %s658_s23, 4  ;;  %s44_s27 = sshll.u32 %s837_s2, 4  ;;  %s20_s24 = int_to_ptr.vmem [resolvable:$true] %s19_s24  ;;  %s45_s27 = int_to_ptr.hbm [resolvable:$true] %s44_s27 }
   0x6   :  { %22 = dma.hbm_to_vmem [thread:$0]  %s18_s22, 32, %s20_s24, [#allocation3]  }
   0x7   :  { %s659_s1 = smov [#allocation7]  }
   0x8   :  { %s46_s28 = sshll.u32 %s659_s1, 4  ;;  %s47_s28 = int_to_ptr.vmem [resolvable:$true] %s46_s28 }
   0x9   :  { %49 = dma.hbm_to_vmem [thread:$0]  %s45_s27, 32, %s47_s28, [#allocation6]  }
   0xa   :  { %651 = dma.done.wait [#allocation3], 32  }
   0xb   :  { %652 = vsyncadd [#allocation3], 4294967264 }
   0xc   :  { %653 = dma.done.wait [#allocation6], 64  }
   0xd   :  { %654 = vsyncadd [#allocation6], 4294967232  ;;  %v660_v0 = vmov 1   ;;  %v661_v1 = vmov 0   ;;  %v662_v2 = vmov 2   ;;  %v663_v5 = vmov 3  }
   0xe   :  { %530 = vset.pattern.permute.xlu1 %v660_v0  ;;  %528 = vset.pattern.permute.xlu0 %v661_v1  ;;  %v740_v3 = vld [vmem:[%s838_s3] sm:$0x3]  ;;  %v74_v4 = vld [vmem:[#allocation7] sm:$0x3]  ;;  %v664_v6 = vmov 8   ;;  %v665_v7 = vmov 4   ;;  %v77_v13 = vlaneseq }
   0xf   :  { %532 = vset.pattern.permute.xlu2 %v662_v2  ;;  %128 = vperm.xlu1 %530, %v740_v3   ;;  %v666_v8 = vmov 9   ;;  %v667_v9 = vmov 5   ;;  %v668_v10 = vmov 10   ;;  %v669_v11 = vmov 6   ;;  %s671_s3 = smov 126   ;;  %s672_s29 = smov 127  }
  0x10   :  { %154 = vperm.xlu2 %532, %v740_v3   ;;  %117 = vperm.xlu0 %528, %v74_v4   ;;  %v670_v12 = vmov 7   ;;  %v78_v14 = vand.u32 127, %v77_v13  ;;  %s673_s30 = smov 125   ;;  %v674_v47 = vmov 13   ;;  %s675_s5 = smov 124   ;;  %v676_v51 = vmov 11  }
  0x11   :  { %v677_v52 = vmov 12   ;;  %s678_s6 = smov 123   ;;  %s679_s7 = smov 122   ;;  %vm394_vm15 = vcmask 89088  }
  0x12   :  { %v84_v15 = vand.u32 65535, %v78_v14  ;;  %v85_v16 = vshrl.u32 %v78_v14, 16  ;;  %s680_s8 = smov 121   ;;  %s681_s9 = smov 120  }
  0x13   :  { %s682_s10 = smov 119   ;;  %s684_s11 = smov 118  }
  0x14   :  { %v88_v17 = vmul.u32 47662, %v84_v15  ;;  %v87_v18 = vmul.u32 35747, %v84_v15  ;;  %v89_v19 = vmul.u32 35747, %v85_v16  ;;  %v90_v23 = vmul.u32 47662, %v85_v16  ;;  %v71_v15 = vld [vmem:[#allocation5] sm:$0x3] }
  0x15   :  { %v779_v16 = vmul.f32 0.0, %v71_v15  ;;  %s686_s12 = smov 11   ;;  %s687_s13 = smov 13  }
  0x16   :  { %v91_v20 = vshll.u32 %v88_v17, 16  ;;  %v93_v21 = vshll.u32 %v89_v19, 16  ;;  %v92_v27 = vshrl.u32 %v88_v17, 16  ;;  %v94_v29 = vshrl.u32 %v89_v19, 16  ;;  %v781_v17 = vld [vmem:[#allocation2] sm:$0x3] }
  0x17   :  { %531 = vset.pattern.permute.xlu1 %v662_v2  ;;  %s688_s14 = smov 1   ;;  %s689_s15 = smov 12  }
  0x18   :  { %529 = vset.pattern.permute.xlu0 %v660_v0  ;;  %150 = vperm.xlu1 %531, %v74_v4   ;;  %vm95_vm0 = vc.u32 %v87_v18, %v91_v20  ;;  %v97_v22 = vadd.s32 %v91_v20, %v87_v18  ;;  %s690_s16 = smov 2   ;;  %s691_s17 = smov 7  }
  0x19   :  { %123 = vperm.xlu0 %529, %v74_v4   ;;  %543 = vset.pattern.permute.xlu2 %v664_v6  ;;  %v96_v24 = vsel %vm95_vm0, 1, %v661_v1  ;;  %s692_s18 = smov 3   ;;  %s693_s19 = smov 9   ;;  %vm144_vm0 = vcmask 7168  }
  0x1a   :  { %306 = vperm.xlu2 %543, %v74_v4   ;;  %vm99_vm1 = vc.u32 %v97_v22, %v93_v21  ;;  %v98_v25 = vadd.s32 %v96_v24, %v90_v23  ;;  %s694_s20 = smov 4   ;;  %s695_s21 = smov 10  }
  0x1b   :  { %v100_v26 = vsel %vm99_vm1, 1, %v661_v1  ;;  %s696_s22 = smov 5   ;;  %s697_s23 = smov 6   ;;  %vm170_vm1 = vcmask 15360  }
  0x1c   :  { %v102_v28 = vadd.s32 %v100_v26, %v98_v25  ;;  %s698_s24 = smov 15   ;;  %s699_s25 = smov 8  }
  0x1d   :  { %s700_s26 = smov 14   ;;  %s701_s27 = smov [#allocation8]  }
  0x1e   :  { %v103_v30 = vadd.s32 %v102_v28, %v92_v27  ;;  %s468_s1 = sshll.u32 %s701_s27, 4  ;;  %s470_s2 = sshll.u32 %s839_s4, 4  ;;  %s469_s1 = int_to_ptr.vmem [resolvable:$true] %s468_s1  ;;  %s471_s2 = int_to_ptr.hbm [resolvable:$true] %s470_s2 }
  0x20   :  { %534 = vset.pattern.permute.xlu1 %v663_v5  ;;  %v104_v31 = vadd.s32 %v103_v30, %v94_v29 }
  0x21   :  { %533 = vset.pattern.permute.xlu0 %v663_v5  ;;  %180 = vperm.xlu1 %534, %v740_v3   ;;  %v683_v5 = vmov 15  }
  0x22   :  { %176 = vperm.xlu0 %533, %v74_v4   ;;  %545 = vset.pattern.permute.xlu2 %v666_v8  ;;  %v105_v32 = vshrl.u32 %v104_v31, 3 }
  0x23   :  { %332 = vperm.xlu2 %545, %v74_v4  }
  0x24   :  { %v106_v33 = vmul.u32 11, %v105_v32 }
  0x26   :  { %v107_v34 = vsub.s32 %v78_v14, %v106_v33 }
  0x28   :  { %vm110_vm2 = vcmp.ne.s32.totalorder %v107_v34, 0  ;;  %vm111_vm3 = vcmp.lt.s32.totalorder %v107_v34, 0  ;;  %v113_v36 = vadd.s32 11, %v107_v34 }
  0x29   :  { %536 = vset.pattern.permute.xlu1 %v665_v7  ;;  %vm112_vm4 = vmand %vm111_vm3, %vm110_vm2  ;;  %vm196_vm2 = vcmask 23552   ;;  %vm222_vm3 = vcmask 31744  }
  0x2a   :  { %535 = vset.pattern.permute.xlu0 %v665_v7  ;;  %206 = vperm.xlu1 %536, %v740_v3   ;;  %v756_v38 = vsel %vm112_vm4, %v113_v36, %v107_v34  ;;  %vm248_vm4 = vcmask 39936  }
  0x2b   :  { %202 = vperm.xlu0 %535, %v74_v4   ;;  %548 = vset.pattern.permute.xlu2 %v668_v10  ;;  %vm148_vm5 = vcmp.ge.s32.totalorder %v756_v38, 2  ;;  %vm121_vm6 = vcmp.ge.s32.totalorder %v756_v38, 1  ;;  %vm174_vm7 = vcmp.ge.s32.totalorder %v756_v38, 3  ;;  %vm200_vm8 = vcmp.ge.s32.totalorder %v756_v38, 4 }
  0x2c   :  { %362 = vperm.xlu2 %548, %v740_v3   ;;  %vm226_vm9 = vcmp.ge.s32.totalorder %v756_v38, 5  ;;  %vm252_vm10 = vcmp.ge.s32.totalorder %v756_v38, 6  ;;  %vm278_vm11 = vcmp.ge.s32.totalorder %v756_v38, 7  ;;  %vm304_vm12 = vcmp.ge.s32.totalorder %v756_v38, 8 }
  0x2d   :  { %vm330_vm13 = vcmp.ge.s32.totalorder %v756_v38, 9  ;;  %vm356_vm14 = vcmp.ge.s32.totalorder %v756_v38, 10 }
  0x32   :  { %538 = vset.pattern.permute.xlu1 %v667_v9 }
  0x33   :  { %537 = vset.pattern.permute.xlu0 %v667_v9  ;;  %232 = vperm.xlu1 %538, %v740_v3  }
  0x34   :  { %228 = vperm.xlu0 %537, %v74_v4   ;;  %549 = vset.pattern.permute.xlu2 %v676_v51 }
  0x3b   :  { %540 = vset.pattern.permute.xlu1 %v669_v11 }
  0x3c   :  { %539 = vset.pattern.permute.xlu0 %v669_v11  ;;  %258 = vperm.xlu1 %540, %v740_v3  }
  0x3d   :  { %254 = vperm.xlu0 %539, %v74_v4  }
  0x44   :  { %542 = vset.pattern.permute.xlu1 %v670_v12 }
  0x45   :  { %541 = vset.pattern.permute.xlu0 %v670_v12  ;;  %284 = vperm.xlu1 %542, %v740_v3  }
  0x46   :  { %280 = vperm.xlu0 %541, %v74_v4  }
  0x4d   :  { %544 = vset.pattern.permute.xlu1 %v664_v6 }
  0x4e   :  { %546 = vset.pattern.permute.xlu0 %v666_v8  ;;  %310 = vperm.xlu1 %544, %v740_v3  }
  0x4f   :  { %336 = vperm.xlu0 %546, %v740_v3  }
  0x56   :  { %547 = vset.pattern.permute.xlu1 %v668_v10  ;;  %v685_v10 = vmov 14  }
  0x57   :  { %358 = vperm.xlu1 %547, %v74_v4   ;;  %550 = vset.pattern.permute.xlu0 %v677_v52 }
  0x5f   :  { %551 = vset.pattern.permute.xlu1 %v674_v47 }
  0x6a   :  { %v155_v39 = vpop.permute.xlu2 %154 }
  0x74   :  { %v307_v59 = vpop.permute.xlu2 %306 }
  0x7d   :  { %v333_v63 = vpop.permute.xlu2 %332 }
  0x81   :  { %v129_v35 = vpop.permute.xlu1 %128 }
  0x82   :  { %v754_v37 = vpop.permute.xlu0 %117 }
  0x83   :  { %v120_v15 = vmul.f32 %v754_v37, %v781_v17 }
  0x86   :  { %v363_v6 = vpop.permute.xlu2 %362 }
  0x8a   :  { %v151_v40 = vpop.permute.xlu1 %150 }
  0x8b   :  { %v124_v41 = vpop.permute.xlu0 %123  ;;  %v157_v42 = vsel %vm148_vm5, %v151_v40, %v155_v39  ;;  %vm274_vm5 = vcmask 48128  }
  0x8c   :  { %v131_v43 = vsel %vm121_vm6, %v124_v41, %v129_v35  ;;  %159 = vrot.lane.b32.xlu0 %v157_v42, %s671_s3  ;;  %vm300_vm6 = vcmask 56320  }
  0x8d   :  { %133 = vrot.lane.b32.xlu1 %v131_v43, %s672_s29 }
  0x93   :  { %v181_v44 = vpop.permute.xlu1 %180 }
  0x94   :  { %v177_v45 = vpop.permute.xlu0 %176 }
  0x95   :  { %v183_v46 = vsel %vm174_vm7, %v177_v45, %v181_v44  ;;  %vm326_vm7 = vcmask 64512  }
  0x96   :  { %185 = vrot.lane.b32.xlu2 %v183_v46, %s673_s30 }
  0x9c   :  { %v207_v48 = vpop.permute.xlu1 %206 }
  0x9d   :  { %v203_v49 = vpop.permute.xlu0 %202 }
  0x9e   :  { %v209_v50 = vsel %vm200_vm8, %v203_v49, %v207_v48  ;;  %vm352_vm8 = vcmask 72704  }
  0x9f   :  { %211 = vrot.lane.b32.xlu2 %v209_v50, %s675_s5 }
  0xa5   :  { %v233_v53 = vpop.permute.xlu1 %232 }
  0xa6   :  { %v229_v54 = vpop.permute.xlu0 %228 }
  0xa7   :  { %v235_v55 = vsel %vm226_vm9, %v229_v54, %v233_v53  ;;  %vm378_vm9 = vcmask 80896  }
  0xa8   :  { %237 = vrot.lane.b32.xlu2 %v235_v55, %s678_s6 }
  0xae   :  { %v259_v56 = vpop.permute.xlu1 %258 }
  0xaf   :  { %v255_v57 = vpop.permute.xlu0 %254 }
  0xb0   :  { %v261_v58 = vsel %vm252_vm10, %v255_v57, %v259_v56  ;;  %vm410_vm10 = vcmask 97280  }
  0xb1   :  { %263 = vrot.lane.b32.xlu2 %v261_v58, %s679_s7 }
  0xb7   :  { %v285_v60 = vpop.permute.xlu1 %284 }
  0xb8   :  { %v281_v61 = vpop.permute.xlu0 %280 }
  0xb9   :  { %v287_v62 = vsel %vm278_vm11, %v281_v61, %v285_v60  ;;  %vm426_vm11 = vcmask 105472  }
  0xba   :  { %289 = vrot.lane.b32.xlu1 %v287_v62, %s680_s8 }
  0xc0   :  { %v311_v0 = vpop.permute.xlu1 %310 }
  0xc1   :  { %v337_v1 = vpop.permute.xlu0 %336  ;;  %v313_v2 = vsel %vm304_vm12, %v307_v59, %v311_v0  ;;  %vm442_vm12 = vcmask 113664  }
  0xc2   :  { %415 = vperm.xlu1 %551, %v740_v3   ;;  %315 = vrot.lane.b32.xlu2 %v313_v2, %s681_s9  ;;  %v339_v4 = vsel %vm330_vm13, %v333_v63, %v337_v1  ;;  %vm458_vm13 = vcmask 121856  }
  0xc3   :  { %341 = vrot.lane.b32.xlu0 %v339_v4, %s682_s10 }
  0xc9   :  { %v359_v7 = vpop.permute.xlu1 %358 }
  0xca   :  { %383 = vperm.xlu2 %549, %v740_v3   ;;  %553 = vset.pattern.permute.xlu1 %v683_v5  ;;  %v365_v8 = vsel %vm356_vm14, %v359_v7, %v363_v6 }
  0xcb   :  { %399 = vperm.xlu0 %550, %v740_v3   ;;  %447 = vperm.xlu1 %553, %v740_v3  }
  0xd2   :  { %552 = vset.pattern.permute.xlu2 %v685_v10 }
  0xd3   :  { %367 = vrot.lane.b32.xlu1 %v365_v8, %s684_s11  ;;  %554 = vset.pattern.permute.xlu0 %v683_v5 }
  0xd4   :  { %431 = vperm.xlu2 %552, %v740_v3  }
  0xf0   :  { %v186_v9 = vpop.permute.xlu2 %185 }
  0xf1   :  { %v188_v35 = vmul.f32 %v186_v9, %v779_v16  ;;  %v189_v40 = vmul.f32 %v186_v9, %v781_v17 }
  0xf9   :  { %v212_v11 = vpop.permute.xlu2 %211 }
  0xfa   :  { %v214_v41 = vmul.f32 %v212_v11, %v779_v16  ;;  %v215_v42 = vmul.f32 %v212_v11, %v781_v17 }
  0xfe   :  { %v160_v22 = vpop.permute.xlu0 %159 }
  0xff   :  { %v134_v18 = vpop.permute.xlu1 %133  ;;  %v162_v31 = vmul.f32 %v160_v22, %v779_v16  ;;  %v163_v34 = vmul.f32 %v160_v22, %v781_v17 }
 0x100   :  { %v136_v26 = vmul.f32 %v134_v18, %v779_v16  ;;  %v137_v30 = vmul.f32 %v134_v18, %v781_v17 }
 0x102   :  { %v773_v12 = vpop.permute.xlu2 %237 }
 0x103   :  { %v240_v43 = vmul.f32 %v773_v12, %v779_v16  ;;  %v241_v46 = vmul.f32 %v773_v12, %v781_v17 }
 0x10b   :  { %v775_v13 = vpop.permute.xlu2 %263 }
 0x10c   :  { %v266_v47 = vmul.f32 %v775_v13, %v779_v16  ;;  %v267_v48 = vmul.f32 %v775_v13, %v781_v17 }
 0x11c   :  { %v777_v14 = vpop.permute.xlu2 %315 }
 0x11d   :  { %v318_v49 = vmul.f32 %v777_v14, %v779_v16  ;;  %v319_v54 = vmul.f32 %v777_v14, %v781_v17 }
 0x124   :  { %v384_v19 = vpop.permute.xlu2 %383 }
 0x125   :  { %v386_v20 = vmul.f32 %v384_v19, %v779_v16  ;;  %v387_v21 = vmul.f32 %v384_v19, %v781_v17 }
 0x127   :  { %390 = vrot.lane.b32.xlu1 %v386_v20, %s686_s12  ;;  %392 = vrot.lane.b32.xlu2 %v387_v21, %s686_s12 }
 0x12c   :  { %v290_v3 = vpop.permute.xlu1 %289 }
 0x12d   :  { %v293_v32 = vmul.f32 %v290_v3, %v781_v17  ;;  %v292_v50 = vmul.f32 %v290_v3, %v779_v16 }
 0x12e   :  { %v432_v52 = vpop.permute.xlu2 %431 }
 0x12f   :  { %v434_v53 = vmul.f32 %v432_v52, %v779_v16  ;;  %v435_v58 = vmul.f32 %v432_v52, %v781_v17 }
 0x134   :  { %v416_v23 = vpop.permute.xlu1 %415 }
 0x135   :  { %v418_v24 = vmul.f32 %v416_v23, %v779_v16  ;;  %v342_v25 = vpop.permute.xlu0 %341  ;;  %v419_v44 = vmul.f32 %v416_v23, %v781_v17 }
 0x136   :  { %v344_v36 = vmul.f32 %v342_v25, %v779_v16  ;;  %v345_v51 = vmul.f32 %v342_v25, %v781_v17 }
 0x137   :  { %422 = vrot.lane.b32.xlu2 %v418_v24, %s687_s13 }
 0x13d   :  { %v400_v27 = vpop.permute.xlu0 %399  ;;  %v448_v33 = vpop.permute.xlu1 %447 }
 0x13e   :  { %v402_v28 = vmul.f32 %v400_v27, %v779_v16  ;;  %v403_v29 = vmul.f32 %v400_v27, %v781_v17  ;;  %v450_v45 = vmul.f32 %v448_v33, %v779_v16  ;;  %v451_v56 = vmul.f32 %v448_v33, %v781_v17 }
 0x13f   :  { %140 = vrot.lane.b32.xlu2 %v136_v26, %s688_s14 }
 0x140   :  { %406 = vrot.lane.b32.xlu0 %v402_v28, %s689_s15  ;;  %408 = vrot.lane.b32.xlu1 %v403_v29, %s689_s15 }
 0x145   :  { %v368_v38 = vpop.permute.xlu1 %367 }
 0x146   :  { %v371_v39 = vmul.f32 %v368_v38, %v781_v17  ;;  %v370_v55 = vmul.f32 %v368_v38, %v779_v16 }
 0x147   :  { %142 = vrot.lane.b32.xlu2 %v137_v30, %s688_s14 }
 0x148   :  { %166 = vrot.lane.b32.xlu1 %v162_v31, %s690_s16  ;;  %298 = vrot.lane.b32.xlu0 %v293_v32, %s691_s17 }
 0x14f   :  { %168 = vrot.lane.b32.xlu2 %v163_v34, %s690_s16 }
 0x150   :  { %192 = vrot.lane.b32.xlu1 %v188_v35, %s692_s18  ;;  %348 = vrot.lane.b32.xlu0 %v344_v36, %s693_s19 }
 0x157   :  { %194 = vrot.lane.b32.xlu2 %v189_v40, %s692_s18 }
 0x158   :  { %218 = vrot.lane.b32.xlu1 %v214_v41, %s694_s20  ;;  %376 = vrot.lane.b32.xlu0 %v371_v39, %s695_s21 }
 0x15f   :  { %220 = vrot.lane.b32.xlu2 %v215_v42, %s694_s20 }
 0x160   :  { %244 = vrot.lane.b32.xlu1 %v240_v43, %s696_s22  ;;  %424 = vrot.lane.b32.xlu0 %v419_v44, %s687_s13 }
 0x167   :  { %246 = vrot.lane.b32.xlu2 %v241_v46, %s696_s22 }
 0x168   :  { %270 = vrot.lane.b32.xlu1 %v266_v47, %s697_s23  ;;  %454 = vrot.lane.b32.xlu0 %v450_v45, %s698_s24 }
 0x16f   :  { %272 = vrot.lane.b32.xlu2 %v267_v48, %s697_s23 }
 0x170   :  { %322 = vrot.lane.b32.xlu1 %v318_v49, %s699_s25 }
 0x177   :  { %296 = vrot.lane.b32.xlu2 %v292_v50, %s691_s17 }
 0x178   :  { %350 = vrot.lane.b32.xlu1 %v345_v51, %s693_s19 }
 0x17f   :  { %324 = vrot.lane.b32.xlu2 %v319_v54, %s699_s25 }
 0x180   :  { %438 = vrot.lane.b32.xlu1 %v434_v53, %s700_s26 }
 0x181   :  { %v393_v57 = vpop.permute.xlu2 %392 }
 0x187   :  { %374 = vrot.lane.b32.xlu2 %v370_v55, %s695_s21 }
 0x188   :  { %456 = vrot.lane.b32.xlu1 %v451_v56, %s698_s24 }
 0x18f   :  { %440 = vrot.lane.b32.xlu2 %v435_v58, %s700_s26 }
 0x191   :  { %v827_v59 = vpop.permute.xlu2 %422 }
 0x199   :  { %v141_v60 = vpop.permute.xlu2 %140  ;;  %v391_v61 = vpop.permute.xlu1 %390 }
 0x19a   :  { %v395_v62 = vsel %vm394_vm15, %v391_v61, %v393_v57 }
 0x1a1   :  { %v143_v63 = vpop.permute.xlu2 %142 }
 0x1a2   :  { %v145_v14 = vsel %vm144_vm0, %v141_v60, %v143_v63 }
 0x1a3   :  { %v147_v18 = vadd.f32 %v145_v14, %v120_v15 }
 0x1a9   :  { %v169_v0 = vpop.permute.xlu2 %168 }
 0x1b1   :  { %v195_v1 = vpop.permute.xlu2 %194 }
 0x1b2   :  { %v409_v2 = vpop.permute.xlu1 %408  ;;  %v407_v8 = vpop.permute.xlu0 %406 }
 0x1b3   :  { %v411_v43 = vsel %vm410_vm10, %v407_v8, %v409_v2 }
 0x1b9   :  { %v221_v4 = vpop.permute.xlu2 %220 }
 0x1ba   :  { %v167_v5 = vpop.permute.xlu1 %166  ;;  %v299_v11 = vpop.permute.xlu0 %298 }
 0x1bb   :  { %v171_v16 = vsel %vm170_vm1, %v167_v5, %v169_v0 }
 0x1bc   :  { %v173_v21 = vadd.f32 %v171_v16, %v147_v18 }
 0x1c1   :  { %v247_v6 = vpop.permute.xlu2 %246 }
 0x1c2   :  { %v193_v7 = vpop.permute.xlu1 %192  ;;  %v349_v3 = vpop.permute.xlu0 %348 }
 0x1c3   :  { %v197_v20 = vsel %vm196_vm2, %v193_v7, %v195_v1 }
 0x1c4   :  { %v199_v23 = vadd.f32 %v197_v20, %v173_v21 }
 0x1c9   :  { %v273_v10 = vpop.permute.xlu2 %272 }
 0x1ca   :  { %v219_v9 = vpop.permute.xlu1 %218  ;;  %v377_v17 = vpop.permute.xlu0 %376 }
 0x1cb   :  { %v223_v22 = vsel %vm222_vm3, %v219_v9, %v221_v4 }
 0x1cc   :  { %v225_v25 = vadd.f32 %v223_v22, %v199_v23 }
 0x1d1   :  { %v297_v13 = vpop.permute.xlu2 %296 }
 0x1d2   :  { %v245_v12 = vpop.permute.xlu1 %244  ;;  %v301_v30 = vsel %vm300_vm6, %v297_v13, %v299_v11  ;;  %v425_v41 = vpop.permute.xlu0 %424 }
 0x1d3   :  { %v249_v24 = vsel %vm248_vm4, %v245_v12, %v247_v6  ;;  %v427_v46 = vsel %vm426_vm11, %v827_v59, %v425_v41 }
 0x1d4   :  { %v251_v28 = vadd.f32 %v249_v24, %v225_v25 }
 0x1d9   :  { %v325_v26 = vpop.permute.xlu2 %324 }
 0x1da   :  { %v271_v19 = vpop.permute.xlu1 %270  ;;  %v455_v50 = vpop.permute.xlu0 %454 }
 0x1db   :  { %v275_v27 = vsel %vm274_vm5, %v271_v19, %v273_v10 }
 0x1dc   :  { %v277_v37 = vadd.f32 %v275_v27, %v251_v28 }
 0x1de   :  { %v303_v32 = vadd.f32 %v301_v30, %v277_v37 }
 0x1e1   :  { %v375_v33 = vpop.permute.xlu2 %374 }
 0x1e2   :  { %v323_v29 = vpop.permute.xlu1 %322  ;;  %v379_v39 = vsel %vm378_vm9, %v375_v33, %v377_v17 }
 0x1e3   :  { %v327_v31 = vsel %vm326_vm7, %v323_v29, %v325_v26 }
 0x1e4   :  { %v329_v34 = vadd.f32 %v327_v31, %v303_v32 }
 0x1e9   :  { %v441_v48 = vpop.permute.xlu2 %440 }
 0x1ea   :  { %v351_v35 = vpop.permute.xlu1 %350 }
 0x1eb   :  { %v353_v36 = vsel %vm352_vm8, %v349_v3, %v351_v35 }
 0x1ec   :  { %v355_v38 = vadd.f32 %v353_v36, %v329_v34 }
 0x1ee   :  { %v381_v40 = vadd.f32 %v379_v39, %v355_v38 }
 0x1f0   :  { %v397_v42 = vadd.f32 %v395_v62, %v381_v40 }
 0x1f2   :  { %v439_v44 = vpop.permute.xlu1 %438  ;;  %v413_v45 = vadd.f32 %v411_v43, %v397_v42 }
 0x1f3   :  { %v443_v49 = vsel %vm442_vm12, %v439_v44, %v441_v48 }
 0x1f4   :  { %v429_v47 = vadd.f32 %v427_v46, %v413_v45 }
 0x1f6   :  { %v445_v51 = vadd.f32 %v443_v49, %v429_v47 }
 0x1fa   :  { %v457_v52 = vpop.permute.xlu1 %456 }
 0x1fb   :  { %v459_v53 = vsel %vm458_vm13, %v455_v50, %v457_v52 }
 0x1fc   :  { %v461_v54 = vadd.f32 %v459_v53, %v445_v51 }
 0x1fe   :  { %462 = vst [vmem:[#allocation8] sm:$0x3] %v461_v54 }
 0x1ff   :  { %473 = dma.vmem_to_hbm [thread:$0]  %s469_s1, 32, %s471_s2, [#allocation4]  }
 0x200   :  { %655 = dma.done.wait [#allocation4], 32  }
 0x201   :  { %656 = vsyncadd [#allocation4], 4294967264 }
 0x202   :  { %478 = vsyncpa [#allocation3], 1 }
 0x203   :  { %479 = vsyncpa [#allocation6], 1 }
 0x204   :  { %480 = vsyncpa [#allocation4], 1 }

</bundles_post_ra>
